<compile_context>
chip_gen: v6e
topology: v6e:2x2x1
jax: 0.10.0
libtpu: 0.0.40
codegen_flags: <defaults>
</compile_context>

<pallas_src>
import functools
import math

import numpy as np

import jax
import jax.numpy as jnp
from jax.experimental import pallas as pl
from jax.experimental.pallas import tpu as pltpu  # noqa: F401  (no TPU-specific params needed at this size)

# ----------------------------- config -----------------------------------
label_list = ["O", "B-PER", "I-PER", "B-LOC", "I-LOC", "B-ORG", "I-ORG"]
NUM_LABELS = len(label_list)

VOCAB_SIZE = 50
POS_TABLE = 100
D_MODEL = 32
SEQ_LEN = 8
NUM_HEADS = 4
D_K = D_MODEL // NUM_HEADS
D_FF = 4 * D_MODEL
BATCH = 2
LN_EPS = 1e-5
CLS_PAD = 128                      # lane-dense padded classifier width

BS = BATCH * SEQ_LEN               # rows of the (B*S, D) activation slab
NUM_CHUNKS = D_MODEL // D_K        # lane chunks per row (== NUM_HEADS)
BHS = NUM_CHUNKS * BS              # total raw-view pseudo tokens = B*H*S


# --------------------------- kernel helpers ------------------------------
def _layernorm(x, w, b):
    mu = jnp.mean(x, axis=-1, keepdims=True)
    var = jnp.mean((x - mu) ** 2, axis=-1, keepdims=True)
    return (x - mu) * jax.lax.rsqrt(var + LN_EPS) * w + b


def _gelu_exact(x):
    # torch.nn.GELU() default: exact erf-based GELU.
    return 0.5 * x * (1.0 + jax.lax.erf(x * (1.0 / math.sqrt(2.0))))


# ------------------- constant index tables (param prep) -------------------
def _pseudo_token_tables():
    """Tables for the chunk-major raw-view pseudo-token layout.

    Chunk-major pseudo token p = c*(B*S) + j where j indexes the (B*S, D) row
    and c the d_k-wide lane chunk.  Under torch's raw .view(B, H, S, d_k):
        b = j // S, s = j % S, head h = (s*H + c) // S, pseudo pos t = (s*H + c) % S.
    Returns:
      mask_sel : (B*S, BHS) f32 selector so that  (1, B*S) key-mask-row @ mask_sel
                 gives the additive key mask per pseudo key position.
      head_bias: (BHS, BHS) f32, 0 within the same (batch, head), -1e30 across.
    """
    p = np.arange(BHS)
    c = p // BS
    j = p % BS
    b = j // SEQ_LEN
    s = j % SEQ_LEN
    h = (s * NUM_HEADS + c) // SEQ_LEN
    t = (s * NUM_HEADS + c) % SEQ_LEN
    bh = b * NUM_HEADS + h

    mask_sel = np.zeros((BS, BHS), np.float32)
    mask_sel[b * SEQ_LEN + t, p] = 1.0

    head_bias = np.where(bh[:, None] == bh[None, :], 0.0, -1.0e30).astype(np.float32)
    return mask_sel, head_bias


# ----------------------------- fused kernel -------------------------------
def bert_kernel(tok_ref, pos_ref, mask_ref, sel_ref, hbias_ref,
                tok_emb_ref, pos_emb_ref, wqkv_ref, bqkv_ref,
                wo_ref, bo_ref, lnw_ref, lnb_ref,
                w1_ref, b1_ref, w2_ref, b2_ref, wc_ref, bc_ref,
                out_ref, *, scale):
    f32 = jnp.float32

    # ---- embeddings: exact gather as one-hot matmuls (MXU is otherwise idle)
    tok_oh = (tok_ref[...] ==
              jax.lax.broadcasted_iota(jnp.int32, (BS, VOCAB_SIZE), 1)).astype(f32)
    pos_oh = (pos_ref[...] ==
              jax.lax.broadcasted_iota(jnp.int32, (BS, POS_TABLE), 1)).astype(f32)
    x = (jnp.dot(tok_oh, tok_emb_ref[...], preferred_element_type=f32)
         + jnp.dot(pos_oh, pos_emb_ref[...], preferred_element_type=f32))    # (BS, D)

    # ---- fused QKV projection: one (BS, D) @ (D, 3D) matmul
    qkv = jnp.dot(x, wqkv_ref[...], preferred_element_type=f32) + bqkv_ref[...]

    # ---- torch raw-view head split, chunk-major pseudo-token layout (no reshape)
    def pseudo_tokens(base):
        return jnp.concatenate(
            [qkv[:, base + c * D_K: base + (c + 1) * D_K] for c in range(NUM_CHUNKS)],
            axis=0)                                                           # (BHS, dk)

    qp = pseudo_tokens(0) * scale
    kp = pseudo_tokens(D_MODEL)
    vp = pseudo_tokens(2 * D_MODEL)

    # ---- attention over all (batch, head) pairs as one dense masked softmax
    s = jax.lax.dot_general(qp, kp, (((1,), (1,)), ((), ())),
                            preferred_element_type=f32)                      # (BHS, BHS)
    # additive key-padding mask built in-kernel from the raw (B, S) int mask
    neg = jnp.where(mask_ref[...] == 0, f32(-1e9), f32(0.0))                 # (B, S)
    negrow = jnp.concatenate([neg[b:b + 1, :] for b in range(BATCH)], axis=1)  # (1, B*S)
    s = s + jnp.dot(negrow, sel_ref[...], preferred_element_type=f32)        # (1, BHS) bcast
    s = s + hbias_ref[...]                                                   # block-diagonal
    s = s - jnp.max(s, axis=-1, keepdims=True)
    p = jnp.exp(s)
    p = p * pl.reciprocal(jnp.sum(p, axis=-1, keepdims=True), approx=True)
    ctx_p = jnp.dot(p, vp, preferred_element_type=f32)                       # (BHS, dk)
    # inverse raw view: back to the (BS, D) activation slab
    ctx = jnp.concatenate(
        [ctx_p[c * BS:(c + 1) * BS, :] for c in range(NUM_CHUNKS)], axis=1)  # (BS, D)

    # ---- o_proj + residual + LN + FFN + residual + (shared) LN + padded cls head
    attn = jnp.dot(ctx, wo_ref[...], preferred_element_type=f32) + bo_ref[...]
    h = _layernorm(x + attn, lnw_ref[...], lnb_ref[...])
    ff = jnp.dot(h, w1_ref[...], preferred_element_type=f32) + b1_ref[...]
    ff = _gelu_exact(ff)
    ff = jnp.dot(ff, w2_ref[...], preferred_element_type=f32) + b2_ref[...]
    h2 = _layernorm(h + ff, lnw_ref[...], lnb_ref[...])                      # shared LayerNorm
    out_ref[...] = jnp.dot(h2, wc_ref[...], preferred_element_type=f32) + bc_ref[...]


# ----------------------------- wrappers -----------------------------------
def prepare_params(params):
    """One-time parameter prep: fused QKV weights, padded classifier, constant tables."""
    mask_sel, head_bias = _pseudo_token_tables()
    prep = {k: params[k] for k in ("tok_emb", "pos_emb", "wo", "bo",
                                   "ln_w", "ln_b", "w1", "b1", "w2", "b2")}
    prep["wqkv"] = jnp.concatenate([params["wq"], params["wk"], params["wv"]], axis=1)
    prep["bqkv"] = jnp.concatenate([params["bq"], params["bk"], params["bv"]], axis=1)
    prep["wc_pad"] = jnp.pad(params["wcls"], ((0, 0), (0, CLS_PAD - NUM_LABELS)))
    prep["bc_pad"] = jnp.pad(params["bcls"], ((0, 0), (0, CLS_PAD - NUM_LABELS)))
    prep["mask_sel"] = jnp.asarray(mask_sel)
    prep["head_bias"] = jnp.asarray(head_bias)
    return prep


@jax.jit
def bert_forward(prep, token_ids, pos_ids, atten_mask):
    B, S = token_ids.shape
    tok_col = token_ids.reshape(B * S, 1).astype(jnp.int32)
    pos_col = pos_ids.reshape(B * S, 1).astype(jnp.int32)

    logits_pad = pl.pallas_call(
        functools.partial(bert_kernel, scale=1.0 / math.sqrt(D_K)),
        out_shape=jax.ShapeDtypeStruct((B * S, CLS_PAD), jnp.float32),
    )(tok_col, pos_col, atten_mask.astype(jnp.int32),
      prep["mask_sel"], prep["head_bias"],
      prep["tok_emb"], prep["pos_emb"], prep["wqkv"], prep["bqkv"],
      prep["wo"], prep["bo"], prep["ln_w"], prep["ln_b"],
      prep["w1"], prep["b1"], prep["w2"], prep["b2"],
      prep["wc_pad"], prep["bc_pad"])

    return logits_pad[:, :NUM_LABELS].reshape(B, S, NUM_LABELS)


def bert_apply(prep, token_ids, pos_ids, atten_mask=None):
    if atten_mask is None:
        atten_mask = jnp.ones(token_ids.shape, dtype=jnp.int32)
    return bert_forward(prep, token_ids, pos_ids, atten_mask)


# ------------------------ pure-JAX reference -------------------------------
def bert_reference(params, token_ids, pos_ids, atten_mask):
    x = (jnp.take(params["tok_emb"], token_ids, axis=0)
         + jnp.take(params["pos_emb"], pos_ids, axis=0)).astype(jnp.float32)
    B, S, D = x.shape
    H, dk = NUM_HEADS, D_K

    def ln(t):
        mu = t.mean(-1, keepdims=True)
        var = ((t - mu) ** 2).mean(-1, keepdims=True)
        return (t - mu) * jax.lax.rsqrt(var + LN_EPS) * params["ln_w"] + params["ln_b"]

    q = x @ params["wq"] + params["bq"]
    k = x @ params["wk"] + params["bk"]
    v = x @ params["wv"] + params["bv"]
    qh = q.reshape(B, H, S, dk)     # torch raw .view (no transpose)
    kh = k.reshape(B, H, S, dk)
    vh = v.reshape(B, H, S, dk)
    s = jnp.einsum("bhqd,bhkd->bhqk", qh, kh) / math.sqrt(dk)
    m = atten_mask.reshape(B, 1, 1, S)
    s = jnp.where(m == 0, -1.0e9, s)
    p = jax.nn.softmax(s, axis=-1)
    ctx = jnp.einsum("bhqk,bhkd->bhqd", p, vh).reshape(B, S, D)
    attn = ctx @ params["wo"] + params["bo"]
    h = ln(x + attn)
    ff = h @ params["w1"] + params["b1"]
    ff = 0.5 * ff * (1.0 + jax.lax.erf(ff / math.sqrt(2.0)))
    ff = ff @ params["w2"] + params["b2"]
    h2 = ln(h + ff)
    return h2 @ params["wcls"] + params["bcls"]


# --------------------------- parameter init --------------------------------
def init_params(key):
    ks = jax.random.split(key, 16)
    n = lambda k, shape, s=0.02: (jax.random.normal(k, shape, dtype=jnp.float32) * s)
    return {
        "tok_emb": n(ks[0], (VOCAB_SIZE, D_MODEL)),
        "pos_emb": n(ks[1], (POS_TABLE, D_MODEL)),
        "wq": n(ks[2], (D_MODEL, D_MODEL)), "bq": n(ks[3], (1, D_MODEL)),
        "wk": n(ks[4], (D_MODEL, D_MODEL)), "bk": n(ks[5], (1, D_MODEL)),
        "wv": n(ks[6], (D_MODEL, D_MODEL)), "bv": n(ks[7], (1, D_MODEL)),
        "wo": n(ks[8], (D_MODEL, D_MODEL)), "bo": n(ks[9], (1, D_MODEL)),
        "ln_w": jnp.ones((1, D_MODEL), jnp.float32),   # torch LayerNorm init
        "ln_b": jnp.zeros((1, D_MODEL), jnp.float32),
        "w1": n(ks[10], (D_MODEL, D_FF)), "b1": n(ks[11], (1, D_FF)),
        "w2": n(ks[12], (D_FF, D_MODEL)), "b2": n(ks[13], (1, D_MODEL)),
        "wcls": n(ks[14], (D_MODEL, NUM_LABELS)), "bcls": n(ks[15], (1, NUM_LABELS)),
    }


# ------------------------------- main ---------------------------------------
if __name__ == "__main__":
    key = jax.random.PRNGKey(0)
    pkey, tkey = jax.random.split(key)
    params = init_params(pkey)
    prep = prepare_params(params)

    token_ids = jax.random.randint(tkey, (BATCH, SEQ_LEN), 0, VOCAB_SIZE, dtype=jnp.int32)
    pos_ids = jnp.broadcast_to(jnp.arange(SEQ_LEN, dtype=jnp.int32), (BATCH, SEQ_LEN))
    # second sequence has 2 padded (masked-out) key positions
    atten_mask = jnp.array(
        [[1] * SEQ_LEN, [1] * (SEQ_LEN - 2) + [0, 0]], dtype=jnp.int32)

    logits = bert_apply(prep, token_ids, pos_ids, atten_mask)
    logits = jax.block_until_ready(logits)

    assert logits.shape == (BATCH, SEQ_LEN, NUM_LABELS)
    assert bool(jnp.all(jnp.isfinite(logits)))

    # sanity: match a pure-JAX reference of the same (raw-view-semantics) module
    ref = bert_reference(params, token_ids, pos_ids, atten_mask)
    max_err = float(jnp.max(jnp.abs(logits - ref)))
    assert max_err < 5e-2, f"mismatch vs reference: {max_err}"

    print("KERNEL_OK")
</pallas_src>

<mosaic_0001>
module attributes {stable_mosaic.version = 11 : i64} {
  func.func @bert_kernel(%arg0: memref<16x1xi32, #tpu.memory_space<vmem>>, %arg1: memref<16x1xi32, #tpu.memory_space<vmem>>, %arg2: memref<2x8xi32, #tpu.memory_space<vmem>>, %arg3: memref<16x64xf32, #tpu.memory_space<vmem>>, %arg4: memref<64x64xf32, #tpu.memory_space<vmem>>, %arg5: memref<50x32xf32, #tpu.memory_space<vmem>>, %arg6: memref<100x32xf32, #tpu.memory_space<vmem>>, %arg7: memref<32x96xf32, #tpu.memory_space<vmem>>, %arg8: memref<1x96xf32, #tpu.memory_space<vmem>>, %arg9: memref<32x32xf32, #tpu.memory_space<vmem>>, %arg10: memref<1x32xf32, #tpu.memory_space<vmem>>, %arg11: memref<1x32xf32, #tpu.memory_space<vmem>>, %arg12: memref<1x32xf32, #tpu.memory_space<vmem>>, %arg13: memref<32x128xf32, #tpu.memory_space<vmem>>, %arg14: memref<1x128xf32, #tpu.memory_space<vmem>>, %arg15: memref<128x32xf32, #tpu.memory_space<vmem>>, %arg16: memref<1x32xf32, #tpu.memory_space<vmem>>, %arg17: memref<32x128xf32, #tpu.memory_space<vmem>>, %arg18: memref<1x128xf32, #tpu.memory_space<vmem>>, %arg19: memref<16x128xf32, #tpu.memory_space<vmem>>) attributes {dimension_semantics = [], scalar_prefetch = 0 : i64, scratch_operands = 0 : i64, tpu.core_type = #tpu.core_type<tc>} {
    %c0 = arith.constant 0 : index
    %c0_0 = arith.constant 0 : index
    %0 = vector.load %arg0[%c0, %c0_0] : memref<16x1xi32, #tpu.memory_space<vmem>>, vector<16x1xi32>
    %1 = tpu.iota {dimensions = array<i32: 1>} : vector<16x50xi32>
    %2 = vector.broadcast %0 : vector<16x1xi32> to vector<16x50xi32>
    %3 = arith.cmpi eq, %2, %1 : vector<16x50xi32>
    %4 = arith.extui %3 : vector<16x50xi1> to vector<16x50xi32>
    %5 = arith.sitofp %4 : vector<16x50xi32> to vector<16x50xf32>
    %c0_1 = arith.constant 0 : index
    %c0_2 = arith.constant 0 : index
    %6 = vector.load %arg1[%c0_1, %c0_2] : memref<16x1xi32, #tpu.memory_space<vmem>>, vector<16x1xi32>
    %7 = tpu.iota {dimensions = array<i32: 1>} : vector<16x100xi32>
    %8 = vector.broadcast %6 : vector<16x1xi32> to vector<16x100xi32>
    %9 = arith.cmpi eq, %8, %7 : vector<16x100xi32>
    %10 = arith.extui %9 : vector<16x100xi1> to vector<16x100xi32>
    %11 = arith.sitofp %10 : vector<16x100xi32> to vector<16x100xf32>
    %c0_3 = arith.constant 0 : index
    %c0_4 = arith.constant 0 : index
    %12 = vector.load %arg5[%c0_3, %c0_4] : memref<50x32xf32, #tpu.memory_space<vmem>>, vector<50x32xf32>
    %cst = arith.constant dense<0.000000e+00> : vector<16x32xf32>
    %13 = tpu.matmul %5, %12, %cst {dimension_numbers = #tpu.dot_dimension_numbers<[1], [0], [0], [1], [0, 0, 1, 1], [], []>} : vector<16x50xf32>, vector<50x32xf32>, vector<16x32xf32> -> vector<16x32xf32>
    %c0_5 = arith.constant 0 : index
    %c0_6 = arith.constant 0 : index
    %14 = vector.load %arg6[%c0_5, %c0_6] : memref<100x32xf32, #tpu.memory_space<vmem>>, vector<100x32xf32>
    %cst_7 = arith.constant dense<0.000000e+00> : vector<16x32xf32>
    %15 = tpu.matmul %11, %14, %cst_7 {dimension_numbers = #tpu.dot_dimension_numbers<[1], [0], [0], [1], [0, 0, 1, 1], [], []>} : vector<16x100xf32>, vector<100x32xf32>, vector<16x32xf32> -> vector<16x32xf32>
    %16 = arith.addf %13, %15 : vector<16x32xf32>
    %c0_8 = arith.constant 0 : index
    %c0_9 = arith.constant 0 : index
    %17 = vector.load %arg7[%c0_8, %c0_9] : memref<32x96xf32, #tpu.memory_space<vmem>>, vector<32x96xf32>
    %cst_10 = arith.constant dense<0.000000e+00> : vector<16x96xf32>
    %18 = tpu.matmul %16, %17, %cst_10 {dimension_numbers = #tpu.dot_dimension_numbers<[1], [0], [0], [1], [0, 0, 1, 1], [], []>} : vector<16x32xf32>, vector<32x96xf32>, vector<16x96xf32> -> vector<16x96xf32>
    %c0_11 = arith.constant 0 : index
    %c0_12 = arith.constant 0 : index
    %19 = vector.load %arg8[%c0_11, %c0_12] : memref<1x96xf32, #tpu.memory_space<vmem>>, vector<1x96xf32>
    %20 = vector.broadcast %19 : vector<1x96xf32> to vector<16x96xf32>
    %21 = arith.addf %18, %20 : vector<16x96xf32>
    %22 = vector.extract_strided_slice %21 {offsets = [0, 0], sizes = [16, 8], strides = [1, 1]} : vector<16x96xf32> to vector<16x8xf32>
    %23 = vector.extract_strided_slice %21 {offsets = [0, 8], sizes = [16, 8], strides = [1, 1]} : vector<16x96xf32> to vector<16x8xf32>
    %24 = vector.extract_strided_slice %21 {offsets = [0, 16], sizes = [16, 8], strides = [1, 1]} : vector<16x96xf32> to vector<16x8xf32>
    %25 = vector.extract_strided_slice %21 {offsets = [0, 24], sizes = [16, 8], strides = [1, 1]} : vector<16x96xf32> to vector<16x8xf32>
    %26 = tpu.concatenate %22, %23, %24, %25 in 0 : vector<16x8xf32>, vector<16x8xf32>, vector<16x8xf32>, vector<16x8xf32> -> vector<64x8xf32>
    %cst_13 = arith.constant 0.353553385 : f32
    %27 = vector.broadcast %cst_13 : f32 to vector<64x8xf32>
    %28 = arith.mulf %26, %27 : vector<64x8xf32>
    %29 = vector.extract_strided_slice %21 {offsets = [0, 32], sizes = [16, 8], strides = [1, 1]} : vector<16x96xf32> to vector<16x8xf32>
    %30 = vector.extract_strided_slice %21 {offsets = [0, 40], sizes = [16, 8], strides = [1, 1]} : vector<16x96xf32> to vector<16x8xf32>
    %31 = vector.extract_strided_slice %21 {offsets = [0, 48], sizes = [16, 8], strides = [1, 1]} : vector<16x96xf32> to vector<16x8xf32>
    %32 = vector.extract_strided_slice %21 {offsets = [0, 56], sizes = [16, 8], strides = [1, 1]} : vector<16x96xf32> to vector<16x8xf32>
    %33 = tpu.concatenate %29, %30, %31, %32 in 0 : vector<16x8xf32>, vector<16x8xf32>, vector<16x8xf32>, vector<16x8xf32> -> vector<64x8xf32>
    %34 = vector.extract_strided_slice %21 {offsets = [0, 64], sizes = [16, 8], strides = [1, 1]} : vector<16x96xf32> to vector<16x8xf32>
    %35 = vector.extract_strided_slice %21 {offsets = [0, 72], sizes = [16, 8], strides = [1, 1]} : vector<16x96xf32> to vector<16x8xf32>
    %36 = vector.extract_strided_slice %21 {offsets = [0, 80], sizes = [16, 8], strides = [1, 1]} : vector<16x96xf32> to vector<16x8xf32>
    %37 = vector.extract_strided_slice %21 {offsets = [0, 88], sizes = [16, 8], strides = [1, 1]} : vector<16x96xf32> to vector<16x8xf32>
    %38 = tpu.concatenate %34, %35, %36, %37 in 0 : vector<16x8xf32>, vector<16x8xf32>, vector<16x8xf32>, vector<16x8xf32> -> vector<64x8xf32>
    %cst_14 = arith.constant dense<0.000000e+00> : vector<64x64xf32>
    %39 = tpu.matmul %28, %33, %cst_14 {dimension_numbers = #tpu.dot_dimension_numbers<[1], [1], [0], [0], [0, 0, 1, 0], [], []>} : vector<64x8xf32>, vector<64x8xf32>, vector<64x64xf32> -> vector<64x64xf32>
    %c0_15 = arith.constant 0 : index
    %c0_16 = arith.constant 0 : index
    %40 = vector.load %arg2[%c0_15, %c0_16] : memref<2x8xi32, #tpu.memory_space<vmem>>, vector<2x8xi32>
    %c0_i32 = arith.constant 0 : i32
    %41 = vector.broadcast %c0_i32 : i32 to vector<2x8xi32>
    %42 = arith.cmpi eq, %40, %41 : vector<2x8xi32>
    %cst_17 = arith.constant -1.000000e+09 : f32
    %cst_18 = arith.constant 0.000000e+00 : f32
    %43 = vector.broadcast %cst_17 : f32 to vector<2x8xf32>
    %44 = vector.broadcast %cst_18 : f32 to vector<2x8xf32>
    %45 = arith.select %42, %43, %44 : vector<2x8xi1>, vector<2x8xf32>
    %46 = vector.extract_strided_slice %45 {offsets = [0, 0], sizes = [1, 8], strides = [1, 1]} : vector<2x8xf32> to vector<1x8xf32>
    %47 = vector.extract_strided_slice %45 {offsets = [1, 0], sizes = [1, 8], strides = [1, 1]} : vector<2x8xf32> to vector<1x8xf32>
    %48 = tpu.concatenate %46, %47 in 1 : vector<1x8xf32>, vector<1x8xf32> -> vector<1x16xf32>
    %c0_19 = arith.constant 0 : index
    %c0_20 = arith.constant 0 : index
    %49 = vector.load %arg3[%c0_19, %c0_20] : memref<16x64xf32, #tpu.memory_space<vmem>>, vector<16x64xf32>
    %cst_21 = arith.constant dense<0.000000e+00> : vector<1x64xf32>
    %50 = tpu.matmul %48, %49, %cst_21 {dimension_numbers = #tpu.dot_dimension_numbers<[1], [0], [0], [1], [0, 0, 1, 1], [], []>} : vector<1x16xf32>, vector<16x64xf32>, vector<1x64xf32> -> vector<1x64xf32>
    %51 = vector.broadcast %50 : vector<1x64xf32> to vector<64x64xf32>
    %52 = arith.addf %39, %51 : vector<64x64xf32>
    %c0_22 = arith.constant 0 : index
    %c0_23 = arith.constant 0 : index
    %53 = vector.load %arg4[%c0_22, %c0_23] : memref<64x64xf32, #tpu.memory_space<vmem>>, vector<64x64xf32>
    %54 = arith.addf %52, %53 : vector<64x64xf32>
    %cst_24 = arith.constant dense<0xFF800000> : vector<64xf32>
    %55 = vector.multi_reduction <maximumf>, %54, %cst_24 [1] : vector<64x64xf32> to vector<64xf32>
    %56 = vector.shape_cast %55 : vector<64xf32> to vector<64x1xf32>
    %57 = vector.broadcast %56 : vector<64x1xf32> to vector<64x64xf32>
    %58 = arith.subf %54, %57 : vector<64x64xf32>
    %59 = math.exp %58 : vector<64x64xf32>
    %cst_25 = arith.constant dense<0.000000e+00> : vector<64xf32>
    %60 = vector.multi_reduction <add>, %59, %cst_25 [1] : vector<64x64xf32> to vector<64xf32>
    %61 = vector.shape_cast %60 : vector<64xf32> to vector<64x1xf32>
    %62 = tpu.reciprocal %61 {approx = true} : vector<64x1xf32> -> vector<64x1xf32>
    %63 = vector.broadcast %62 : vector<64x1xf32> to vector<64x64xf32>
    %64 = arith.mulf %59, %63 : vector<64x64xf32>
    %cst_26 = arith.constant dense<0.000000e+00> : vector<64x8xf32>
    %65 = tpu.matmul %64, %38, %cst_26 {dimension_numbers = #tpu.dot_dimension_numbers<[1], [0], [0], [1], [0, 0, 1, 1], [], []>} : vector<64x64xf32>, vector<64x8xf32>, vector<64x8xf32> -> vector<64x8xf32>
    %66 = vector.extract_strided_slice %65 {offsets = [0, 0], sizes = [16, 8], strides = [1, 1]} : vector<64x8xf32> to vector<16x8xf32>
    %67 = vector.extract_strided_slice %65 {offsets = [16, 0], sizes = [16, 8], strides = [1, 1]} : vector<64x8xf32> to vector<16x8xf32>
    %68 = vector.extract_strided_slice %65 {offsets = [32, 0], sizes = [16, 8], strides = [1, 1]} : vector<64x8xf32> to vector<16x8xf32>
    %69 = vector.extract_strided_slice %65 {offsets = [48, 0], sizes = [16, 8], strides = [1, 1]} : vector<64x8xf32> to vector<16x8xf32>
    %70 = tpu.concatenate %66, %67, %68, %69 in 1 : vector<16x8xf32>, vector<16x8xf32>, vector<16x8xf32>, vector<16x8xf32> -> vector<16x32xf32>
    %c0_27 = arith.constant 0 : index
    %c0_28 = arith.constant 0 : index
    %71 = vector.load %arg9[%c0_27, %c0_28] : memref<32x32xf32, #tpu.memory_space<vmem>>, vector<32x32xf32>
    %cst_29 = arith.constant dense<0.000000e+00> : vector<16x32xf32>
    %72 = tpu.matmul %70, %71, %cst_29 {dimension_numbers = #tpu.dot_dimension_numbers<[1], [0], [0], [1], [0, 0, 1, 1], [], []>} : vector<16x32xf32>, vector<32x32xf32>, vector<16x32xf32> -> vector<16x32xf32>
    %c0_30 = arith.constant 0 : index
    %c0_31 = arith.constant 0 : index
    %73 = vector.load %arg10[%c0_30, %c0_31] : memref<1x32xf32, #tpu.memory_space<vmem>>, vector<1x32xf32>
    %74 = vector.broadcast %73 : vector<1x32xf32> to vector<16x32xf32>
    %75 = arith.addf %72, %74 : vector<16x32xf32>
    %76 = arith.addf %16, %75 : vector<16x32xf32>
    %c0_32 = arith.constant 0 : index
    %c0_33 = arith.constant 0 : index
    %77 = vector.load %arg11[%c0_32, %c0_33] : memref<1x32xf32, #tpu.memory_space<vmem>>, vector<1x32xf32>
    %c0_34 = arith.constant 0 : index
    %c0_35 = arith.constant 0 : index
    %78 = vector.load %arg12[%c0_34, %c0_35] : memref<1x32xf32, #tpu.memory_space<vmem>>, vector<1x32xf32>
    %cst_36 = arith.constant dense<0.000000e+00> : vector<16xf32>
    %79 = vector.multi_reduction <add>, %76, %cst_36 [1] : vector<16x32xf32> to vector<16xf32>
    %80 = vector.shape_cast %79 : vector<16xf32> to vector<16x1xf32>
    %cst_37 = arith.constant 3.200000e+01 : f32
    %81 = vector.broadcast %cst_37 : f32 to vector<16x1xf32>
    %82 = arith.divf %80, %81 : vector<16x1xf32>
    %83 = vector.broadcast %82 : vector<16x1xf32> to vector<16x32xf32>
    %84 = arith.subf %76, %83 : vector<16x32xf32>
    %85 = arith.mulf %84, %84 : vector<16x32xf32>
    %cst_38 = arith.constant dense<0.000000e+00> : vector<16xf32>
    %86 = vector.multi_reduction <add>, %85, %cst_38 [1] : vector<16x32xf32> to vector<16xf32>
    %87 = vector.shape_cast %86 : vector<16xf32> to vector<16x1xf32>
    %cst_39 = arith.constant 3.200000e+01 : f32
    %88 = vector.broadcast %cst_39 : f32 to vector<16x1xf32>
    %89 = arith.divf %87, %88 : vector<16x1xf32>
    %90 = vector.broadcast %82 : vector<16x1xf32> to vector<16x32xf32>
    %91 = arith.subf %76, %90 : vector<16x32xf32>
    %cst_40 = arith.constant 9.99999974E-6 : f32
    %92 = vector.broadcast %cst_40 : f32 to vector<16x1xf32>
    %93 = arith.addf %89, %92 : vector<16x1xf32>
    %94 = math.rsqrt %93 : vector<16x1xf32>
    %95 = vector.broadcast %94 : vector<16x1xf32> to vector<16x32xf32>
    %96 = arith.mulf %91, %95 : vector<16x32xf32>
    %97 = vector.broadcast %77 : vector<1x32xf32> to vector<16x32xf32>
    %98 = arith.mulf %96, %97 : vector<16x32xf32>
    %99 = vector.broadcast %78 : vector<1x32xf32> to vector<16x32xf32>
    %100 = arith.addf %98, %99 : vector<16x32xf32>
    %c0_41 = arith.constant 0 : index
    %c0_42 = arith.constant 0 : index
    %101 = vector.load %arg13[%c0_41, %c0_42] : memref<32x128xf32, #tpu.memory_space<vmem>>, vector<32x128xf32>
    %cst_43 = arith.constant dense<0.000000e+00> : vector<16x128xf32>
    %102 = tpu.matmul %100, %101, %cst_43 {dimension_numbers = #tpu.dot_dimension_numbers<[1], [0], [0], [1], [0, 0, 1, 1], [], []>} : vector<16x32xf32>, vector<32x128xf32>, vector<16x128xf32> -> vector<16x128xf32>
    %c0_44 = arith.constant 0 : index
    %c0_45 = arith.constant 0 : index
    %103 = vector.load %arg14[%c0_44, %c0_45] : memref<1x128xf32, #tpu.memory_space<vmem>>, vector<1x128xf32>
    %104 = vector.broadcast %103 : vector<1x128xf32> to vector<16x128xf32>
    %105 = arith.addf %102, %104 : vector<16x128xf32>
    %cst_46 = arith.constant 5.000000e-01 : f32
    %106 = vector.broadcast %cst_46 : f32 to vector<16x128xf32>
    %107 = arith.mulf %106, %105 : vector<16x128xf32>
    %cst_47 = arith.constant 0.707106769 : f32
    %108 = vector.broadcast %cst_47 : f32 to vector<16x128xf32>
    %109 = arith.mulf %105, %108 : vector<16x128xf32>
    %110 = math.erf %109 : vector<16x128xf32>
    %cst_48 = arith.constant 1.000000e+00 : f32
    %111 = vector.broadcast %cst_48 : f32 to vector<16x128xf32>
    %112 = arith.addf %111, %110 : vector<16x128xf32>
    %113 = arith.mulf %107, %112 : vector<16x128xf32>
    %c0_49 = arith.constant 0 : index
    %c0_50 = arith.constant 0 : index
    %114 = vector.load %arg15[%c0_49, %c0_50] : memref<128x32xf32, #tpu.memory_space<vmem>>, vector<128x32xf32>
    %cst_51 = arith.constant dense<0.000000e+00> : vector<16x32xf32>
    %115 = tpu.matmul %113, %114, %cst_51 {dimension_numbers = #tpu.dot_dimension_numbers<[1], [0], [0], [1], [0, 0, 1, 1], [], []>} : vector<16x128xf32>, vector<128x32xf32>, vector<16x32xf32> -> vector<16x32xf32>
    %c0_52 = arith.constant 0 : index
    %c0_53 = arith.constant 0 : index
    %116 = vector.load %arg16[%c0_52, %c0_53] : memref<1x32xf32, #tpu.memory_space<vmem>>, vector<1x32xf32>
    %117 = vector.broadcast %116 : vector<1x32xf32> to vector<16x32xf32>
    %118 = arith.addf %115, %117 : vector<16x32xf32>
    %119 = arith.addf %100, %118 : vector<16x32xf32>
    %c0_54 = arith.constant 0 : index
    %c0_55 = arith.constant 0 : index
    %120 = vector.load %arg11[%c0_54, %c0_55] : memref<1x32xf32, #tpu.memory_space<vmem>>, vector<1x32xf32>
    %c0_56 = arith.constant 0 : index
    %c0_57 = arith.constant 0 : index
    %121 = vector.load %arg12[%c0_56, %c0_57] : memref<1x32xf32, #tpu.memory_space<vmem>>, vector<1x32xf32>
    %cst_58 = arith.constant dense<0.000000e+00> : vector<16xf32>
    %122 = vector.multi_reduction <add>, %119, %cst_58 [1] : vector<16x32xf32> to vector<16xf32>
    %123 = vector.shape_cast %122 : vector<16xf32> to vector<16x1xf32>
    %cst_59 = arith.constant 3.200000e+01 : f32
    %124 = vector.broadcast %cst_59 : f32 to vector<16x1xf32>
    %125 = arith.divf %123, %124 : vector<16x1xf32>
    %126 = vector.broadcast %125 : vector<16x1xf32> to vector<16x32xf32>
    %127 = arith.subf %119, %126 : vector<16x32xf32>
    %128 = arith.mulf %127, %127 : vector<16x32xf32>
    %cst_60 = arith.constant dense<0.000000e+00> : vector<16xf32>
    %129 = vector.multi_reduction <add>, %128, %cst_60 [1] : vector<16x32xf32> to vector<16xf32>
    %130 = vector.shape_cast %129 : vector<16xf32> to vector<16x1xf32>
    %cst_61 = arith.constant 3.200000e+01 : f32
    %131 = vector.broadcast %cst_61 : f32 to vector<16x1xf32>
    %132 = arith.divf %130, %131 : vector<16x1xf32>
    %133 = vector.broadcast %125 : vector<16x1xf32> to vector<16x32xf32>
    %134 = arith.subf %119, %133 : vector<16x32xf32>
    %cst_62 = arith.constant 9.99999974E-6 : f32
    %135 = vector.broadcast %cst_62 : f32 to vector<16x1xf32>
    %136 = arith.addf %132, %135 : vector<16x1xf32>
    %137 = math.rsqrt %136 : vector<16x1xf32>
    %138 = vector.broadcast %137 : vector<16x1xf32> to vector<16x32xf32>
    %139 = arith.mulf %134, %138 : vector<16x32xf32>
    %140 = vector.broadcast %120 : vector<1x32xf32> to vector<16x32xf32>
    %141 = arith.mulf %139, %140 : vector<16x32xf32>
    %142 = vector.broadcast %121 : vector<1x32xf32> to vector<16x32xf32>
    %143 = arith.addf %141, %142 : vector<16x32xf32>
    %c0_63 = arith.constant 0 : index
    %c0_64 = arith.constant 0 : index
    %144 = vector.load %arg17[%c0_63, %c0_64] : memref<32x128xf32, #tpu.memory_space<vmem>>, vector<32x128xf32>
    %cst_65 = arith.constant dense<0.000000e+00> : vector<16x128xf32>
    %145 = tpu.matmul %143, %144, %cst_65 {dimension_numbers = #tpu.dot_dimension_numbers<[1], [0], [0], [1], [0, 0, 1, 1], [], []>} : vector<16x32xf32>, vector<32x128xf32>, vector<16x128xf32> -> vector<16x128xf32>
    %c0_66 = arith.constant 0 : index
    %c0_67 = arith.constant 0 : index
    %146 = vector.load %arg18[%c0_66, %c0_67] : memref<1x128xf32, #tpu.memory_space<vmem>>, vector<1x128xf32>
    %147 = vector.broadcast %146 : vector<1x128xf32> to vector<16x128xf32>
    %148 = arith.addf %145, %147 : vector<16x128xf32>
    %c0_68 = arith.constant 0 : index
    %c0_69 = arith.constant 0 : index
    %149 = vector.load %arg19[%c0_68, %c0_69] : memref<16x128xf32, #tpu.memory_space<vmem>>, vector<16x128xf32>
    tpu.vector_store %arg19[%c0_68, %c0_69], %148 {strides = array<i32>} : memref<16x128xf32, #tpu.memory_space<vmem>>, vector<16x128xf32>,
    return
  }
}

</mosaic_0001>

<bundles_post_ra>
// kernel: bert_forward.1
= control target key start
LH: loop header
LB: loop body
LE: loop exit
PB: predicated region body
PF: predicated region fallthrough
CT: control target
= control target key end

     0   :  { %vm119_vm0 = vcmask 1043456   ;;  %v1810_v0 = vmov 0   ;;  %vm205_vm1 = vcmask 1041408   ;;  %v64_v25 = vlaneseq  ;;  %s1812_s22 = smov 104   ;;  %s2318_s0 = inlined_call_operand.vmem [shape: s32[16,1], index: 0, kind: input, shape index: {}]   ;;  %s2319_s1 = inlined_call_operand.vmem [shape: s32[16,1], index: 1, kind: input, shape index: {}]   ;;  %s2320_s6 = inlined_call_operand.vmem [shape: f32[100,32], index: 6, kind: input, shape index: {}]   ;;  %s2321_s5 = inlined_call_operand.vmem [shape: f32[50,32], index: 5, kind: input, shape index: {}]   ;;  %s2322_s7 = inlined_call_operand.vmem [shape: f32[32,96], index: 7, kind: input, shape index: {}]   ;;  %s2323_s8 = inlined_call_operand.vmem [shape: f32[1,96], index: 8, kind: input, shape index: {}]   ;;  %s2324_s2 = inlined_call_operand.vmem [shape: s32[2,8], index: 2, kind: input, shape index: {}]   ;;  %s2325_s3 = inlined_call_operand.vmem [shape: f32[16,64], index: 3, kind: input, shape index: {}]   ;;  %s2326_s4 = inlined_call_operand.vmem [shape: f32[64,64], index: 4, kind: input, shape index: {}]   ;;  %s2327_s9 = inlined_call_operand.vmem [shape: f32[32,32], index: 9, kind: input, shape index: {}]   ;;  %s2328_s10 = inlined_call_operand.vmem [shape: f32[1,32], index: 10, kind: input, shape index: {}]   ;;  %s2329_s13 = inlined_call_operand.vmem [shape: f32[32,128], index: 13, kind: input, shape index: {}]   ;;  %s2330_s15 = inlined_call_operand.vmem [shape: f32[128,32], index: 15, kind: input, shape index: {}]   ;;  %s2331_s11 = inlined_call_operand.vmem [shape: f32[1,32], index: 11, kind: input, shape index: {}]   ;;  %s2332_s12 = inlined_call_operand.vmem [shape: f32[1,32], index: 12, kind: input, shape index: {}]   ;;  %s2333_s14 = inlined_call_operand.vmem [shape: f32[1,128], index: 14, kind: input, shape index: {}]   ;;  %s2334_s16 = inlined_call_operand.vmem [shape: f32[1,32], index: 16, kind: input, shape index: {}]   ;;  %s2335_s17 = inlined_call_operand.vmem [shape: f32[32,128], index: 17, kind: input, shape index: {}]   ;;  %s2336_s18 = inlined_call_operand.vmem [shape: f32[1,128], index: 18, kind: input, shape index: {}]   ;;  %s2337_s19 = inlined_call_operand.vmem [shape: f32[16,128], index: 19, kind: output, shape index: {}]  }
   0x1   :  { %2342 = sst [smem:[#allocation2_spill]] %s2318_s0  ;;  %1765 = vset.pattern.permute.xlu1 %v1810_v0  ;;  %1764 = vset.pattern.permute.xlu0 %v1810_v0  ;;  %vm198_vm2 = vcmask 408576   ;;  %v1811_v29 = vmov 0.0   ;;  %vm112_vm5 = vcmask 818176   ;;  %v287_v36 = vld [vmem:[%s2322_s7 + $0x18] sm:$0xff]  ;;  %v286_v37 = vld [vmem:[%s2322_s7 + $0x10] sm:$0xff] }
   0x2   :  { %2343 = sst [smem:[#allocation3_spill]] %s2319_s1  ;;  %v65_v26 = vand.u32 127, %v64_v25  ;;  %v285_v38 = vld [vmem:[%s2322_s7 + $0x8] sm:$0xff]  ;;  %v284_v39 = vld [vmem:[%s2322_s7] sm:$0xff]  ;;  %vm295_vm8 = vcmask 261120   ;;  %vm413_vm9 = vcmask 64512  }
   0x3   :  { %2344 = sst [smem:[#allocation4_spill]] %s2320_s6  ;;  %v1424_v46 = vld [vmem:[%s2323_s8] ss:$0 sm:$0xff]  ;;  %s1814_s8 = smov 120   ;;  %v416_v61 = vld [vmem:[%s2325_s3 + $0x8] sm:$0xff]  ;;  %vm1816_vm11 = vmmov 0  }
   0x4   :  { %2345 = sst [smem:[#allocation5_spill]] %s2321_s5  ;;  %s1815_s6 = smov 96   ;;  %v405_v55 = vld [vmem:[%s2324_s2] sm:$0x3]  ;;  %vm417_vm12 = vcmask 130048   ;;  %vm672_vm13 = vcmask 523264  }
   0x5   :  { %s2346_s20 = sld [smem:[#allocation2_spill]]  ;;  %vm406_vm10 = vcmp.eq.s32.totalorder %v405_v55, 0  ;;  %v415_v62 = vld [vmem:[%s2325_s3] sm:$0xff]  ;;  %s1819_s7 = smov 16   ;;  %vm942_vm14 = vcmask 195584  }
   0x6   :  { %s2347_s23 = sld [smem:[#allocation4_spill]]  ;;  %v407_v59 = vsel %vm406_vm10, -1e+09, %v1811_v29  ;;  %s1820_s1 = smov 24  }
   0x7   :  { %s2348_s27 = sld [smem:[#allocation3_spill]]  ;;  %v409_v60 = vrot.slane %v407_v59, 1 }
   0xb   :  { %v63_v1 = vld [vmem:[%s2346_s20 + $0x8] sm:$0xff]  ;;  %v62_v2 = vld [vmem:[%s2346_s20] sm:$0xff]  ;;  %s2349_s20 = sld [smem:[#allocation5_spill]] }
   0xc   :  { %70 = vperm.xlu1 %1765, %v63_v1   ;;  %67 = vperm.xlu0 %1764, %v62_v2   ;;  %v111_v3 = vld [vmem:[%s2347_s23 + $0x60] sm:$0xf]  ;;  %v110_v4 = vld [vmem:[%s2347_s23 + $0x58] sm:$0xff]  ;;  %v109_v8 = vld [vmem:[%s2347_s23 + $0x50] sm:$0xff] }
   0xd   :  { %v79_v5 = vld [vmem:[%s2348_s27 + $0x8] sm:$0xff]  ;;  %v78_v6 = vld [vmem:[%s2348_s27] sm:$0xff]  ;;  %1565 = vmatprep.subr.msk.mxu0 %vm119_vm0, %v111_v3  ;;  %v106_v14 = vld [vmem:[%s2347_s23 + $0x38] sm:$0xff]  ;;  %s1817_s27 = smov 8  }
   0xe   :  { %1566 = vmatpush3.msk.msra.mxu0 %vm119_vm0, %v111_v3  ;;  %v108_v10 = vld [vmem:[%s2347_s23 + $0x48] sm:$0xff]  ;;  %v107_v12 = vld [vmem:[%s2347_s23 + $0x40] sm:$0xff]  ;;  %v105_v16 = vld [vmem:[%s2347_s23 + $0x30] sm:$0xff] }
   0xf   :  { %1567 = vmatprep.subr.mxu0 %v110_v4  ;;  %v104_v18 = vld [vmem:[%s2347_s23 + $0x28] sm:$0xff]  ;;  %v103_v20 = vld [vmem:[%s2347_s23 + $0x20] sm:$0xff]  ;;  %v102_v21 = vld [vmem:[%s2347_s23 + $0x18] sm:$0xff] }
  0x10   :  { %84 = vperm.xlu1 %1765, %v79_v5   ;;  %81 = vperm.xlu0 %1764, %v78_v6   ;;  %v101_v22 = vld [vmem:[%s2347_s23 + $0x10] sm:$0xff]  ;;  %v100_v23 = vld [vmem:[%s2347_s23 + $0x8] sm:$0xff]  ;;  %v99_v24 = vld [vmem:[%s2347_s23] sm:$0xff]  ;;  %s1818_s23 = smov 64  }
  0x11   :  { %v98_v7 = vld [vmem:[%s2349_s20 + $0x30] sm:$0x3]  ;;  %v97_v9 = vld [vmem:[%s2349_s20 + $0x28] sm:$0xff]  ;;  %1568 = vmatpush3.msra.mxu0 %v110_v4  ;;  %v96_v11 = vld [vmem:[%s2349_s20 + $0x20] sm:$0xff] }
  0x12   :  { %1594 = vmatprep.subr.msk.mxu1 %vm205_vm1, %v98_v7  ;;  %1569 = vmatprep.subr.mxu0 %v109_v8  ;;  %v95_v13 = vld [vmem:[%s2349_s20 + $0x18] sm:$0xff]  ;;  %v94_v15 = vld [vmem:[%s2349_s20 + $0x10] sm:$0xff]  ;;  %v93_v17 = vld [vmem:[%s2349_s20 + $0x8] sm:$0xff] }
  0x13   :  { %1595 = vmatpush3.msk.msra.mxu1 %vm205_vm1, %v98_v7  ;;  %1570 = vmatpush3.msra.mxu0 %v109_v8  ;;  %v92_v19 = vld [vmem:[%s2349_s20] sm:$0xff]  ;;  %s1813_s20 = smov 112  }
  0x14   :  { %1596 = vmatprep.subr.mxu1 %v97_v9  ;;  %1571 = vmatprep.subr.mxu0 %v108_v10 }
  0x15   :  { %1597 = vmatpush3.msra.mxu1 %v97_v9  ;;  %1572 = vmatpush3.msra.mxu0 %v108_v10 }
  0x16   :  { %1598 = vmatprep.subr.mxu1 %v96_v11  ;;  %1573 = vmatprep.subr.mxu0 %v107_v12 }
  0x17   :  { %1599 = vmatpush3.msra.mxu1 %v96_v11  ;;  %1574 = vmatpush3.msra.mxu0 %v107_v12 }
  0x18   :  { %1600 = vmatprep.subr.mxu1 %v95_v13  ;;  %1575 = vmatprep.subr.mxu0 %v106_v14 }
  0x19   :  { %1601 = vmatpush3.msra.mxu1 %v95_v13  ;;  %1576 = vmatpush3.msra.mxu0 %v106_v14 }
  0x1a   :  { %1602 = vmatprep.subr.mxu1 %v94_v15  ;;  %1577 = vmatprep.subr.mxu0 %v105_v16 }
  0x1b   :  { %1603 = vmatpush3.msra.mxu1 %v94_v15  ;;  %1578 = vmatpush3.msra.mxu0 %v105_v16 }
  0x1c   :  { %1604 = vmatprep.subr.mxu1 %v93_v17  ;;  %1579 = vmatprep.subr.mxu0 %v104_v18 }
  0x1d   :  { %1605 = vmatpush3.msra.mxu1 %v93_v17  ;;  %1580 = vmatpush3.msra.mxu0 %v104_v18  ;;  %v492_v18 = vshrl.u32 %v64_v25, 7  ;;  %v659_v25 = vld [vmem:[%s2326_s4 + $0x18] sm:$0xff] }
  0x1e   :  { %1606 = vmatprep.subr.mxu1 %v92_v19  ;;  %1581 = vmatprep.subr.mxu0 %v103_v20 }
  0x1f   :  { %1607 = vmatpush3.msra.mxu1 %v92_v19  ;;  %1582 = vmatpush3.msra.mxu0 %v103_v20  ;;  %v493_v19 = vsub.s32 0, %v492_v18 }
  0x20   :  { %1583 = vmatprep.subr.mxu0 %v102_v21  ;;  %1611 = vmatprep.subr.mxu1 %v287_v36 }
  0x21   :  { %1584 = vmatpush3.msra.mxu0 %v102_v21 }
  0x22   :  { %1585 = vmatprep.subr.mxu0 %v101_v22 }
  0x23   :  { %1586 = vmatpush3.msra.mxu0 %v101_v22  ;;  %v657_v22 = vld [vmem:[%s2326_s4 + $0x8] sm:$0xff] }
  0x24   :  { %1587 = vmatprep.subr.mxu0 %v100_v23 }
  0x25   :  { %1588 = vmatpush3.msra.mxu0 %v100_v23 }
  0x26   :  { %1589 = vmatprep.subr.mxu0 %v99_v24 }
  0x27   :  { %1590 = vmatpush3.msra.mxu0 %v99_v24 }
  0x87   :  { %v71_v27 = vpop.permute.xlu1 %70  ;;  %v68_v28 = vpop.permute.xlu0 %67 }
  0x88   :  { %vm73_vm3 = vcmp.eq.s32.totalorder %v71_v27, %v65_v26  ;;  %vm72_vm4 = vcmp.eq.s32.totalorder %v68_v28, %v65_v26 }
  0x89   :  { %v1415_v30 = vsel %vm73_vm3, 1.0, %v1811_v29  ;;  %v1414_v31 = vsel %vm72_vm4, 1.0, %v1811_v29 }
  0x8a   :  { %1608 = vmatprep.mubr.msk.f32.mxu1 %vm198_vm2, %v1414_v31 }
  0x8b   :  { %v85_v32 = vpop.permute.xlu1 %84  ;;  %1609 = vmatmul.mubr.msk.f32.vlgmr.msra.gmra.mxu1 %vm198_vm2, %v1415_v30  ;;  %v82_v33 = vpop.permute.xlu0 %81 }
  0x8c   :  { %vm87_vm6 = vcmp.eq.s32.totalorder %v85_v32, %v65_v26  ;;  %vm86_vm7 = vcmp.eq.s32.totalorder %v82_v33, %v65_v26  ;;  %1612 = vmatpush3.msra.mxu1 %v287_v36  ;;  %v656_v26 = vld [vmem:[%s2326_s4] sm:$0xff] }
  0x8d   :  { %v1417_v34 = vsel %vm87_vm6, 1.0, %v1811_v29  ;;  %v1416_v35 = vsel %vm86_vm7, 1.0, %v1811_v29  ;;  %1613 = vmatprep.subr.mxu1 %v286_v37 }
  0x8e   :  { %1591 = vmatprep.mubr.msk.f32.mxu0 %vm112_vm5, %v1416_v35  ;;  %1614 = vmatpush3.msra.mxu1 %v286_v37 }
  0x8f   :  { %1592 = vmatmul.mubr.msk.f32.vlgmr.msra.gmra.mxu0 %vm112_vm5, %v1417_v34  ;;  %1615 = vmatprep.subr.mxu1 %v285_v38  ;;  %v658_v34 = vld [vmem:[%s2326_s4 + $0x10] sm:$0xff] }
  0x90   :  { %1616 = vmatpush3.msra.mxu1 %v285_v38 }
  0x91   :  { %1617 = vmatprep.subr.mxu1 %v284_v39 }
  0x92   :  { %1618 = vmatpush3.msra.mxu1 %v284_v39  ;;  %v661_v39 = vld [vmem:[%s2326_s4 + $0x28] sm:$0xff] }
  0x93   :  { %1622 = vmatprep.subr.mxu1 %v1811_v29 }
 0x14b   :  { %v1610_v40 = vpop.f32.mrf.mxu1 }
 0x14d   :  { %v275_v42 = vpop.f32.mrf.mxu1 }
 0x14f   :  { %v1593_v41 = vpop.f32.mrf.mxu0 }
 0x150   :  { %v2013_v45 = vadd.f32 %v1610_v40, %v1593_v41 }
 0x151   :  { %v189_v43 = vpop.f32.mrf.mxu0 }
 0x152   :  { %v2011_v44 = vadd.f32 %v275_v42, %v189_v43  ;;  %v660_v43 = vld [vmem:[%s2326_s4 + $0x20] sm:$0xff] }
 0x154   :  { %1619 = vmatprep.mubr.msk.f32.mxu1 %vm295_vm8, %v2011_v44 }
 0x155   :  { %1620 = vmatmul.mubr.msk.f32.vlgmr.msra.gmra.mxu1 %vm295_vm8, %v2013_v45 }
 0x156   :  { %1623 = vmatpush3.msra.mxu1 %v416_v61  ;;  %1626 = vmatprep.mubr.msk.f32.mxu1 %vm1816_vm11, %v1811_v29 }
 0x157   :  { %1624 = vmatprep.subr.mxu1 %v1811_v29 }
 0x158   :  { %1625 = vmatpush3.msra.mxu1 %v415_v62 }
 0x215   :  { %v1621_v47 = vpop.f32.mrf.mxu1 }
 0x216   :  { %v2022_v48 = vadd.f32 %v1621_v47, %v1424_v46 }
 0x217   :  { %v368_v49 = vpop.f32.mrf.mxu1 }
 0x218   :  { %v2024_v50 = vadd.f32 %v1424_v46, %v368_v49  ;;  %393 = vrot.lane.b32.xlu0 %v2022_v48, %s1812_s22  ;;  %v398_v9 = vmul.f32 0.35355338, %v2022_v48 }
 0x21a   :  { %391 = vrot.lane.b32.xlu1 %v2024_v50, %s1812_s22  ;;  %v397_v51 = vmul.f32 0.35355338, %v2024_v50 }
 0x21c   :  { %387 = vrot.lane.b32.xlu0 %v2022_v48, %s1813_s20  ;;  %1645 = vmatprep.mubr.msk.f32.mxu0 %vm413_vm9, %v397_v51 }
 0x21e   :  { %385 = vrot.lane.b32.xlu1 %v2024_v50, %s1813_s20 }
 0x220   :  { %381 = vrot.lane.b32.xlu0 %v2022_v48, %s1814_s8 }
 0x222   :  { %379 = vrot.lane.b32.xlu1 %v2024_v50, %s1814_s8 }
 0x28a   :  { %v2034_v52 = vpop.permute.xlu0 %393 }
 0x28b   :  { %509 = vrot.lane.b32.xlu0 %v2034_v52, %s1815_s6  ;;  %v404_v15 = vmul.f32 0.35355338, %v2034_v52 }
 0x28c   :  { %v2037_v53 = vpop.permute.xlu1 %391 }
 0x28d   :  { %507 = vrot.lane.b32.xlu1 %v2037_v53, %s1815_s6  ;;  %v403_v14 = vmul.f32 0.35355338, %v2037_v53 }
 0x28e   :  { %v2040_v54 = vpop.permute.xlu0 %387 }
 0x28f   :  { %505 = vrot.lane.b32.xlu0 %v2040_v54, %s1815_s6  ;;  %v402_v13 = vmul.f32 0.35355338, %v2040_v54 }
 0x290   :  { %v2046_v56 = vpop.permute.xlu1 %385 }
 0x291   :  { %503 = vrot.lane.b32.xlu1 %v2046_v56, %s1815_s6  ;;  %v401_v12 = vmul.f32 0.35355338, %v2046_v56 }
 0x292   :  { %v2049_v57 = vpop.permute.xlu0 %381 }
 0x293   :  { %501 = vrot.lane.b32.xlu0 %v2049_v57, %s1815_s6  ;;  %v400_v11 = vmul.f32 0.35355338, %v2049_v57 }
 0x294   :  { %v2052_v58 = vpop.permute.xlu1 %379 }
 0x295   :  { %499 = vrot.lane.b32.xlu1 %v2052_v58, %s1815_s6  ;;  %v399_v10 = vmul.f32 0.35355338, %v2052_v58 }
 0x297   :  { %497 = vrot.lane.b32.xlu0 %v2022_v48, %s1815_s6 }
 0x299   :  { %495 = vrot.lane.b32.xlu1 %v2024_v50, %s1815_s6 }
 0x29b   :  { %410 = vrot.lane.b32.xlu0 %v409_v60, %s1817_s27 }
 0x2fd   :  { %v510_v63 = vpop.permute.xlu0 %509 }
 0x2fe   :  { %1629 = vmatprep.subr.msk.mxu0 %vm413_vm9, %v510_v63 }
 0x2ff   :  { %1630 = vmatpush3.xpose.msk.msra.mxu0 %vm413_vm9, %v510_v63  ;;  %v508_v0 = vpop.permute.xlu1 %507  ;;  %v662_v63 = vld [vmem:[%s2326_s4 + $0x30] sm:$0xff] }
 0x300   :  { %1631 = vmatprep.subr.msk.mxu0 %vm413_vm9, %v508_v0 }
 0x301   :  { %v506_v1 = vpop.permute.xlu0 %505 }
 0x303   :  { %1632 = vmatpush3.xpose.msk.msra.mxu0 %vm413_vm9, %v508_v0  ;;  %v504_v3 = vpop.permute.xlu1 %503 }
 0x304   :  { %1633 = vmatprep.subr.msk.mxu0 %vm413_vm9, %v506_v1 }
 0x305   :  { %v502_v2 = vpop.permute.xlu0 %501 }
 0x307   :  { %1634 = vmatpush3.xpose.msk.msra.mxu0 %vm413_vm9, %v506_v1  ;;  %v500_v7 = vpop.permute.xlu1 %499 }
 0x308   :  { %1635 = vmatprep.subr.msk.mxu0 %vm413_vm9, %v504_v3 }
 0x309   :  { %v498_v4 = vpop.permute.xlu0 %497 }
 0x30b   :  { %1636 = vmatpush3.xpose.msk.msra.mxu0 %vm413_vm9, %v504_v3  ;;  %v496_v8 = vpop.permute.xlu1 %495 }
 0x30c   :  { %1637 = vmatprep.subr.msk.mxu0 %vm413_vm9, %v502_v2 }
 0x30d   :  { %v411_v5 = vpop.permute.xlu0 %410 }
 0x30e   :  { %v414_v6 = vsel %vm413_vm9, %v407_v59, %v411_v5  ;;  %v663_v59 = vld [vmem:[%s2326_s4 + $0x38] sm:$0xff] }
 0x30f   :  { %1638 = vmatpush3.xpose.msk.msra.mxu0 %vm413_vm9, %v502_v2  ;;  %1627 = vmatmul.mubr.msk.f32.vlgmr.msra.gmra.mxu1 %vm417_vm12, %v414_v6 }
 0x310   :  { %1639 = vmatprep.subr.msk.mxu0 %vm413_vm9, %v500_v7 }
 0x313   :  { %1640 = vmatpush3.xpose.msk.msra.mxu0 %vm413_vm9, %v500_v7 }
 0x314   :  { %1641 = vmatprep.subr.msk.mxu0 %vm413_vm9, %v498_v4 }
 0x317   :  { %1642 = vmatpush3.xpose.msk.msra.mxu0 %vm413_vm9, %v498_v4 }
 0x318   :  { %1643 = vmatprep.subr.msk.mxu0 %vm413_vm9, %v496_v8 }
 0x31b   :  { %1644 = vmatpush3.xpose.msk.msra.mxu0 %vm413_vm9, %v496_v8 }
 0x31e   :  { %1646 = vmatmul.mubr.msk.f32.vlgmr.msra.gmra.mxu0 %vm413_vm9, %v398_v9 }
 0x31f   :  { %1648 = vmatprep.mubr.msk.f32.mxu0 %vm413_vm9, %v399_v10 }
 0x322   :  { %1649 = vmatmul.mubr.msk.f32.gmra.mxu0 %vm413_vm9, %v400_v11 }
 0x323   :  { %1651 = vmatprep.mubr.msk.f32.mxu0 %vm413_vm9, %v401_v12 }
 0x326   :  { %1652 = vmatmul.mubr.msk.f32.gmra.mxu0 %vm413_vm9, %v402_v13 }
 0x327   :  { %1654 = vmatprep.mubr.msk.f32.mxu0 %vm413_vm9, %v403_v14 }
 0x32a   :  { %1655 = vmatmul.mubr.msk.f32.gmra.mxu0 %vm413_vm9, %v404_v15 }
 0x3cf   :  { %v487_v16 = vpop.f32.mrf.mxu1 }
 0x3d0   :  { %v494_v20 = vrot.slane %v487_v16, %v493_v19 }
 0x3d1   :  { %v1628_v17 = vpop.f32.mrf.mxu1 }
 0x3de   :  { %v1647_v21 = vpop.f32.mrf.mxu0 }
 0x3df   :  { %v623_v23 = vadd.f32 %v1647_v21, %v494_v20 }
 0x3e0   :  { %v617_v24 = vpop.f32.mrf.mxu0 }
 0x3e1   :  { %v618_v27 = vadd.f32 %v617_v24, %v494_v20  ;;  %v665_v28 = vadd.f32 %v657_v22, %v623_v23 }
 0x3e2   :  { %v1650_v29 = vpop.f32.mrf.mxu0 }
 0x3e3   :  { %v633_v30 = vadd.f32 %v1650_v29, %v494_v20  ;;  %v676_v31 = vsel %vm672_vm13, %v665_v28, -inf  ;;  %v664_v32 = vadd.f32 %v656_v26, %v618_v27 }
 0x3e4   :  { %677 = vmax.xlane.f32.xlu0 %v676_v31  ;;  %v627_v33 = vpop.f32.mrf.mxu0 }
 0x3e5   :  { %v628_v35 = vadd.f32 %v627_v33, %v494_v20  ;;  %v673_v36 = vsel %vm672_vm13, %v664_v32, -inf  ;;  %v667_v37 = vadd.f32 %v659_v25, %v633_v30 }
 0x3e6   :  { %v1653_v38 = vpop.f32.mrf.mxu0  ;;  %674 = vmax.xlane.f32.xlu1 %v673_v36 }
 0x3e7   :  { %v643_v40 = vadd.f32 %v1653_v38, %v494_v20  ;;  %v666_v41 = vadd.f32 %v658_v34, %v628_v35  ;;  %v682_v49 = vsel %vm672_vm13, %v667_v37, -inf }
 0x3e8   :  { %v637_v42 = vpop.f32.mrf.mxu0 }
 0x3e9   :  { %v638_v46 = vadd.f32 %v637_v42, %v494_v20  ;;  %v679_v47 = vsel %vm672_vm13, %v666_v41, -inf  ;;  %v669_v51 = vadd.f32 %v661_v39, %v643_v40 }
 0x3ea   :  { %v1656_v55 = vpop.f32.mrf.mxu0  ;;  %680 = vmax.xlane.f32.xlu0 %v679_v47  ;;  %683 = vmax.xlane.f32.xlu1 %v682_v49 }
 0x3eb   :  { %v653_v60 = vadd.f32 %v1656_v55, %v494_v20  ;;  %v668_v61 = vadd.f32 %v660_v43, %v638_v46  ;;  %v688_v2 = vsel %vm672_vm13, %v669_v51, -inf }
 0x3ec   :  { %v647_v62 = vpop.f32.mrf.mxu0 }
 0x3ed   :  { %v648_v0 = vadd.f32 %v647_v62, %v494_v20  ;;  %v685_v1 = vsel %vm672_vm13, %v668_v61, -inf  ;;  %v671_v3 = vadd.f32 %v663_v59, %v653_v60 }
 0x3ee   :  { %686 = vmax.xlane.f32.xlu0 %v685_v1  ;;  %689 = vmax.xlane.f32.xlu1 %v688_v2 }
 0x3ef   :  { %v670_v4 = vadd.f32 %v662_v63, %v648_v0  ;;  %v694_v6 = vsel %vm672_vm13, %v671_v3, -inf }
 0x3f1   :  { %v691_v5 = vsel %vm672_vm13, %v670_v4, -inf }
 0x3f2   :  { %692 = vmax.xlane.f32.xlu0 %v691_v5  ;;  %695 = vmax.xlane.f32.xlu1 %v694_v6 }
 0x403   :  { %773 = vrot.lane.b32.xlu1 %v2037_v53, %s1818_s23 }
 0x407   :  { %771 = vrot.lane.b32.xlu1 %v2040_v54, %s1818_s23 }
 0x408   :  { %775 = vrot.lane.b32.xlu0 %v2034_v52, %s1818_s23 }
 0x40b   :  { %767 = vrot.lane.b32.xlu1 %v2049_v57, %s1818_s23 }
 0x40c   :  { %769 = vrot.lane.b32.xlu0 %v2046_v56, %s1818_s23 }
 0x410   :  { %765 = vrot.lane.b32.xlu0 %v2052_v58, %s1818_s23 }
 0x46d   :  { %v678_v7 = vpop.xlane.xlu0 %677 }
 0x46e   :  { %v698_v8 = vsub.f32 %v665_v28, %v678_v7 }
 0x46f   :  { %v675_v9 = vpop.xlane.xlu1 %674 }
 0x470   :  { %v707_v10 = vmul.f32 1.442695, %v698_v8  ;;  %v697_v53 = vsub.f32 %v664_v32, %v675_v9 }
 0x472   :  { %1766 = vpow2.f32 %v707_v10  ;;  %v705_v11 = vmul.f32 1.442695, %v697_v53 }
 0x473   :  { %v681_v54 = vpop.xlane.xlu0 %680  ;;  %v684_v12 = vpop.xlane.xlu1 %683 }
 0x474   :  { %1768 = vpow2.f32 %v705_v11  ;;  %v699_v52 = vsub.f32 %v666_v41, %v681_v54  ;;  %v700_v13 = vsub.f32 %v667_v37, %v684_v12 }
 0x476   :  { %v709_v14 = vmul.f32 1.442695, %v699_v52  ;;  %v711_v57 = vmul.f32 1.442695, %v700_v13 }
 0x477   :  { %v687_v15 = vpop.xlane.xlu0 %686  ;;  %v690_v16 = vpop.xlane.xlu1 %689 }
 0x478   :  { %1770 = vpow2.f32 %v709_v14  ;;  %v701_v56 = vsub.f32 %v668_v61, %v687_v15  ;;  %v702_v17 = vsub.f32 %v669_v51, %v690_v16  ;;  %v948_v14 = vld [vmem:[%s2327_s9 + $0x18] sm:$0xff]  ;;  %v946_v15 = vld [vmem:[%s2327_s9 + $0x8] sm:$0xff]  ;;  %v945_v16 = vld [vmem:[%s2327_s9] sm:$0xff] }
 0x479   :  { %1772 = vpow2.f32 %v711_v57  ;;  %v947_v57 = vld [vmem:[%s2327_s9 + $0x10] sm:$0xff] }
 0x47a   :  { %v713_v58 = vmul.f32 1.442695, %v701_v56  ;;  %v715_v18 = vmul.f32 1.442695, %v702_v17 }
 0x47b   :  { %v693_v19 = vpop.xlane.xlu0 %692  ;;  %v696_v20 = vpop.xlane.xlu1 %695 }
 0x47c   :  { %1774 = vpow2.f32 %v713_v58  ;;  %v703_v21 = vsub.f32 %v670_v4, %v693_v19  ;;  %v704_v22 = vsub.f32 %v671_v3, %v696_v20 }
 0x47d   :  { %1776 = vpow2.f32 %v715_v18 }
 0x47e   :  { %v717_v23 = vmul.f32 1.442695, %v703_v21  ;;  %v719_v24 = vmul.f32 1.442695, %v704_v22 }
 0x47f   :  { %v2144_v26 = vpop.eup %1766  ;;  %v776_v27 = vpop.permute.xlu0 %775 }
 0x480   :  { %v774_v28 = vpop.permute.xlu1 %773  ;;  %1778 = vpow2.f32 %v717_v23  ;;  %1657 = vmatprep.subr.mxu1 %v776_v27  ;;  %v724_v29 = vsel %vm672_vm13, %v2144_v26, 0.0 }
 0x481   :  { %v1769_v25 = vpop.eup %1768  ;;  %1780 = vpow2.f32 %v719_v24  ;;  %1658 = vmatpush3.msra.mxu1 %v776_v27  ;;  %725 = vadd.xlane.f32.xlu1 %v724_v29 }
 0x482   :  { %1659 = vmatprep.subr.mxu1 %v774_v28  ;;  %v721_v30 = vsel %vm672_vm13, %v1769_v25, 0.0 }
 0x483   :  { %v770_v31 = vpop.permute.xlu0 %769  ;;  %722 = vadd.xlane.f32.xlu0 %v721_v30  ;;  %1660 = vmatpush3.msra.mxu1 %v774_v28 }
 0x484   :  { %v772_v32 = vpop.permute.xlu1 %771 }
 0x485   :  { %1661 = vmatprep.subr.mxu1 %v772_v32  ;;  %v1771_v33 = vpop.eup %1770 }
 0x486   :  { %1662 = vmatpush3.msra.mxu1 %v772_v32  ;;  %v1773_v34 = vpop.eup %1772  ;;  %v727_v35 = vsel %vm672_vm13, %v1771_v33, 0.0 }
 0x487   :  { %1663 = vmatprep.subr.mxu1 %v770_v31  ;;  %728 = vadd.xlane.f32.xlu0 %v727_v35  ;;  %v730_v36 = vsel %vm672_vm13, %v1773_v34, 0.0  ;;  %v766_v39 = vpop.permute.xlu0 %765  ;;  %v1452_v35 = vld [vmem:[%s2328_s10] ss:$0 sm:$0xff] }
 0x488   :  { %1664 = vmatpush3.msra.mxu1 %v770_v31  ;;  %v768_v37 = vpop.permute.xlu1 %767  ;;  %731 = vadd.xlane.f32.xlu1 %v730_v36 }
 0x489   :  { %1665 = vmatprep.subr.mxu1 %v768_v37  ;;  %v1775_v38 = vpop.eup %1774 }
 0x48a   :  { %1666 = vmatpush3.msra.mxu1 %v768_v37  ;;  %v1777_v40 = vpop.eup %1776  ;;  %v733_v41 = vsel %vm672_vm13, %v1775_v38, 0.0 }
 0x48b   :  { %1667 = vmatprep.subr.mxu1 %v766_v39  ;;  %734 = vadd.xlane.f32.xlu0 %v733_v41  ;;  %v736_v42 = vsel %vm672_vm13, %v1777_v40, 0.0 }
 0x48c   :  { %1668 = vmatpush3.msra.mxu1 %v766_v39  ;;  %737 = vadd.xlane.f32.xlu1 %v736_v42 }
 0x48d   :  { %v1779_v43 = vpop.eup %1778 }
 0x48e   :  { %v1781_v46 = vpop.eup %1780  ;;  %v739_v47 = vsel %vm672_vm13, %v1779_v43, 0.0 }
 0x48f   :  { %740 = vadd.xlane.f32.xlu0 %v739_v47  ;;  %v742_v49 = vsel %vm672_vm13, %v1781_v46, 0.0 }
 0x490   :  { %743 = vadd.xlane.f32.xlu1 %v742_v49 }
 0x4a1   :  { %763 = vrot.lane.b32.xlu1 %v2022_v48, %s1818_s23 }
 0x4a5   :  { %761 = vrot.lane.b32.xlu0 %v2024_v50, %s1818_s23 }
 0x50a   :  { %v726_v55 = vpop.xlane.xlu1 %725 }
 0x50c   :  { %v723_v51 = vpop.xlane.xlu0 %722 }
 0x50d   :  { %1782 = vrcp.f32 %v723_v51 }
 0x50e   :  { %1784 = vrcp.f32 %v726_v55 }
 0x510   :  { %v729_v59 = vpop.xlane.xlu0 %728 }
 0x511   :  { %1786 = vrcp.f32 %v729_v59  ;;  %v732_v60 = vpop.xlane.xlu1 %731 }
 0x512   :  { %1788 = vrcp.f32 %v732_v60 }
 0x514   :  { %v735_v61 = vpop.xlane.xlu0 %734 }
 0x515   :  { %1790 = vrcp.f32 %v735_v61  ;;  %v738_v62 = vpop.xlane.xlu1 %737 }
 0x516   :  { %1792 = vrcp.f32 %v738_v62 }
 0x518   :  { %v741_v63 = vpop.xlane.xlu0 %740 }
 0x519   :  { %1794 = vrcp.f32 %v741_v63  ;;  %v744_v0 = vpop.xlane.xlu1 %743  ;;  %v1086_v63 = vld [vmem:[%s2329_s13 + $0x10] sm:$0xff] }
 0x51a   :  { %v1783_v1 = vpop.eup %1782  ;;  %1796 = vrcp.f32 %v744_v0  ;;  %v1085_v0 = vld [vmem:[%s2329_s13 + $0x8] sm:$0xff] }
 0x51b   :  { %v753_v48 = vmul.f32 %v1783_v1, %v1769_v25  ;;  %v1785_v2 = vpop.eup %1784  ;;  %v1084_v1 = vld [vmem:[%s2329_s13] sm:$0xff] }
 0x51c   :  { %v762_v4 = vpop.permute.xlu0 %761  ;;  %v754_v6 = vmul.f32 %v1785_v2, %v2144_v26  ;;  %v1200_v2 = vld [vmem:[%s2330_s15 + $0x70] sm:$0xff] }
 0x51d   :  { %v764_v50 = vpop.permute.xlu1 %763  ;;  %1673 = vmatprep.mubr.msk.f32.mxu1 %vm672_vm13, %v753_v48  ;;  %v1201_v48 = vld [vmem:[%s2330_s15 + $0x78] sm:$0xff] }
 0x51e   :  { %v1787_v3 = vpop.eup %1786  ;;  %1669 = vmatprep.subr.mxu1 %v764_v50  ;;  %1707 = vmatprep.subr.mxu0 %v1201_v48 }
 0x51f   :  { %1670 = vmatpush3.msra.mxu1 %v764_v50  ;;  %v755_v5 = vmul.f32 %v1787_v3, %v1771_v33  ;;  %v1789_v7 = vpop.eup %1788  ;;  %1708 = vmatpush3.msra.mxu0 %v1201_v48  ;;  %v1199_v50 = vld [vmem:[%s2330_s15 + $0x68] sm:$0xff] }
 0x520   :  { %1671 = vmatprep.subr.mxu1 %v762_v4  ;;  %v756_v10 = vmul.f32 %v1789_v7, %v1773_v34  ;;  %1709 = vmatprep.subr.mxu0 %v1200_v2 }
 0x521   :  { %1672 = vmatpush3.msra.mxu1 %v762_v4  ;;  %1710 = vmatpush3.msra.mxu0 %v1200_v2 }
 0x522   :  { %v1791_v8 = vpop.eup %1790  ;;  %1674 = vmatmul.mubr.msk.f32.vlgmr.msra.gmra.mxu1 %vm672_vm13, %v754_v6  ;;  %1685 = vmatprep.subr.mxu1 %v948_v14 }
 0x523   :  { %1676 = vmatprep.mubr.msk.f32.mxu1 %vm672_vm13, %v755_v5  ;;  %v757_v9 = vmul.f32 %v1791_v8, %v1775_v38  ;;  %v1793_v53 = vpop.eup %1792  ;;  %1686 = vmatpush3.msra.mxu1 %v948_v14 }
 0x524   :  { %v758_v12 = vmul.f32 %v1793_v53, %v1777_v40  ;;  %1687 = vmatprep.subr.mxu1 %v947_v57  ;;  %1711 = vmatprep.subr.mxu0 %v1199_v50  ;;  %v2221_v53 = vld [vmem:[%s2331_s11] ss:$0 sm:$0xff] }
 0x525   :  { %1688 = vmatpush3.msra.mxu1 %v947_v57  ;;  %1712 = vmatpush3.msra.mxu0 %v1199_v50  ;;  %v1319_v50 = vld [vmem:[%s2335_s17 + $0x18] sm:$0xff] }
 0x526   :  { %v1795_v11 = vpop.eup %1794  ;;  %1677 = vmatmul.mubr.msk.f32.gmra.mxu1 %vm672_vm13, %v756_v10  ;;  %1689 = vmatprep.subr.mxu1 %v946_v15 }
 0x527   :  { %1679 = vmatprep.mubr.msk.f32.mxu1 %vm672_vm13, %v757_v9  ;;  %v759_v54 = vmul.f32 %v1795_v11, %v1779_v43  ;;  %v1797_v52 = vpop.eup %1796  ;;  %1690 = vmatpush3.msra.mxu1 %v946_v15  ;;  %v1198_v15 = vld [vmem:[%s2330_s15 + $0x60] sm:$0xff] }
 0x528   :  { %v760_v13 = vmul.f32 %v1797_v52, %v1781_v46  ;;  %1691 = vmatprep.subr.mxu1 %v945_v16  ;;  %v2227_v52 = vld [vmem:[%s2332_s12] ss:$0 sm:$0xff]  ;;  %1713 = vmatprep.subr.mxu0 %v1198_v15 }
 0x529   :  { %1692 = vmatpush3.msra.mxu1 %v945_v16  ;;  %1714 = vmatpush3.msra.mxu0 %v1198_v15  ;;  %v1197_v16 = vld [vmem:[%s2330_s15 + $0x58] sm:$0xff] }
 0x52a   :  { %1680 = vmatmul.mubr.msk.f32.gmra.mxu1 %vm672_vm13, %v758_v12  ;;  %1715 = vmatprep.subr.mxu0 %v1197_v16 }
 0x52b   :  { %1682 = vmatprep.mubr.msk.f32.mxu1 %vm672_vm13, %v759_v54  ;;  %1716 = vmatpush3.msra.mxu0 %v1197_v16 }
 0x52e   :  { %1683 = vmatmul.mubr.msk.f32.gmra.mxu1 %vm672_vm13, %v760_v13 }
 0x5e2   :  { %v1675_v56 = vpop.f32.mrf.mxu1 }
 0x5e4   :  { %v875_v17 = vpop.f32.mrf.mxu1 }
 0x5e6   :  { %v1678_v58 = vpop.f32.mrf.mxu1 }
 0x5e7   :  { %918 = vrot.lane.b32.xlu0 %v1678_v58, %s1817_s27  ;;  %v1194_v58 = vld [vmem:[%s2330_s15 + $0x40] sm:$0xff] }
 0x5e8   :  { %v885_v18 = vpop.f32.mrf.mxu1 }
 0x5e9   :  { %916 = vrot.lane.b32.xlu1 %v885_v18, %s1817_s27  ;;  %v1193_v18 = vld [vmem:[%s2330_s15 + $0x38] sm:$0xff] }
 0x5ea   :  { %v1681_v19 = vpop.f32.mrf.mxu1 }
 0x5eb   :  { %926 = vrot.lane.b32.xlu0 %v1681_v19, %s1819_s7  ;;  %v1192_v19 = vld [vmem:[%s2330_s15 + $0x30] sm:$0xff] }
 0x5ec   :  { %v895_v20 = vpop.f32.mrf.mxu1 }
 0x5ed   :  { %924 = vrot.lane.b32.xlu1 %v895_v20, %s1819_s7  ;;  %v1191_v20 = vld [vmem:[%s2330_s15 + $0x28] sm:$0xff] }
 0x5ee   :  { %v1684_v21 = vpop.f32.mrf.mxu1 }
 0x5ef   :  { %934 = vrot.lane.b32.xlu0 %v1684_v21, %s1820_s1  ;;  %v1190_v21 = vld [vmem:[%s2330_s15 + $0x20] sm:$0xff] }
 0x5f0   :  { %v905_v22 = vpop.f32.mrf.mxu1 }
 0x5f1   :  { %932 = vrot.lane.b32.xlu1 %v905_v22, %s1820_s1  ;;  %v1189_v22 = vld [vmem:[%s2330_s15 + $0x18] sm:$0xff] }
 0x659   :  { %v919_v23 = vpop.permute.xlu0 %918 }
 0x65a   :  { %v939_v25 = vsel %vm413_vm9, %v1675_v56, %v919_v23  ;;  %v1196_v56 = vld [vmem:[%s2330_s15 + $0x50] sm:$0xff] }
 0x65b   :  { %v917_v24 = vpop.permute.xlu1 %916  ;;  %1717 = vmatprep.subr.mxu0 %v1196_v56  ;;  %v1188_v23 = vld [vmem:[%s2330_s15 + $0x10] sm:$0xff] }
 0x65c   :  { %v938_v28 = vsel %vm413_vm9, %v875_v17, %v917_v24  ;;  %1718 = vmatpush3.msra.mxu0 %v1196_v56  ;;  %v1195_v17 = vld [vmem:[%s2330_s15 + $0x48] sm:$0xff] }
 0x65d   :  { %v927_v26 = vpop.permute.xlu0 %926  ;;  %1719 = vmatprep.subr.mxu0 %v1195_v17  ;;  %v1187_v24 = vld [vmem:[%s2330_s15 + $0x8] sm:$0xff] }
 0x65e   :  { %v941_v32 = vsel %vm417_vm12, %v939_v25, %v927_v26  ;;  %1720 = vmatpush3.msra.mxu0 %v1195_v17  ;;  %v1186_v26 = vld [vmem:[%s2330_s15] sm:$0xff] }
 0x65f   :  { %v925_v27 = vpop.permute.xlu1 %924  ;;  %1721 = vmatprep.subr.mxu0 %v1194_v58  ;;  %v1461_v17 = vld [vmem:[%s2336_s18] ss:$0 sm:$0xff] }
 0x660   :  { %v940_v30 = vsel %vm417_vm12, %v938_v28, %v925_v27  ;;  %1722 = vmatpush3.msra.mxu0 %v1194_v58  ;;  %v1457_v27 = vld [vmem:[%s2333_s14] ss:$0 sm:$0xff] }
 0x661   :  { %v935_v29 = vpop.permute.xlu0 %934  ;;  %1723 = vmatprep.subr.mxu0 %v1193_v18 }
 0x662   :  { %v944_v34 = vsel %vm942_vm14, %v941_v32, %v935_v29  ;;  %1724 = vmatpush3.msra.mxu0 %v1193_v18 }
 0x663   :  { %v933_v31 = vpop.permute.xlu1 %932  ;;  %1725 = vmatprep.subr.mxu0 %v1192_v19 }
 0x664   :  { %v943_v33 = vsel %vm942_vm14, %v940_v30, %v933_v31  ;;  %1726 = vmatpush3.msra.mxu0 %v1192_v19 }
 0x665   :  { %1693 = vmatprep.mubr.msk.f32.mxu1 %vm295_vm8, %v943_v33  ;;  %1727 = vmatprep.subr.mxu0 %v1191_v20 }
 0x666   :  { %1694 = vmatmul.mubr.msk.f32.vlgmr.msra.gmra.mxu1 %vm295_vm8, %v944_v34  ;;  %1728 = vmatpush3.msra.mxu0 %v1191_v20 }
 0x667   :  { %1729 = vmatprep.subr.mxu0 %v1190_v21 }
 0x668   :  { %1730 = vmatpush3.msra.mxu0 %v1190_v21 }
 0x669   :  { %1731 = vmatprep.subr.mxu0 %v1189_v22 }
 0x66a   :  { %1732 = vmatpush3.msra.mxu0 %v1189_v22 }
 0x66b   :  { %1733 = vmatprep.subr.mxu0 %v1188_v23 }
 0x66c   :  { %1734 = vmatpush3.msra.mxu0 %v1188_v23 }
 0x66d   :  { %1735 = vmatprep.subr.mxu0 %v1187_v24 }
 0x66e   :  { %1736 = vmatpush3.msra.mxu0 %v1187_v24 }
 0x66f   :  { %1737 = vmatprep.subr.mxu0 %v1186_v26 }
 0x670   :  { %1738 = vmatpush3.msra.mxu0 %v1186_v26 }
 0x726   :  { %v1695_v36 = vpop.f32.mrf.mxu1 }
 0x727   :  { %v1034_v37 = vadd.f32 %v1695_v36, %v1452_v35 }
 0x728   :  { %v1028_v38 = vpop.f32.mrf.mxu1 }
 0x729   :  { %v1029_v39 = vadd.f32 %v1452_v35, %v1028_v38  ;;  %v1038_v40 = vadd.f32 %v1034_v37, %v2013_v45 }
 0x72b   :  { %v1044_v41 = vsel %vm295_vm8, %v1038_v40, 0.0  ;;  %v1037_v42 = vadd.f32 %v1029_v39, %v2011_v44  ;;  %v1087_v44 = vld [vmem:[%s2329_s13 + $0x18] sm:$0xff] }
 0x72c   :  { %1045 = vadd.xlane.f32.xlu0 %v1044_v41  ;;  %1696 = vmatprep.subr.mxu1 %v1087_v44  ;;  %v1460_v41 = vld [vmem:[%s2334_s16] ss:$0 sm:$0xff] }
 0x72d   :  { %v1041_v43 = vsel %vm295_vm8, %v1037_v42, 0.0  ;;  %1697 = vmatpush3.msra.mxu1 %v1087_v44 }
 0x72e   :  { %1042 = vadd.xlane.f32.xlu1 %v1041_v43  ;;  %1698 = vmatprep.subr.mxu1 %v1086_v63 }
 0x72f   :  { %1699 = vmatpush3.msra.mxu1 %v1086_v63 }
 0x730   :  { %1700 = vmatprep.subr.mxu1 %v1085_v0 }
 0x731   :  { %1701 = vmatpush3.msra.mxu1 %v1085_v0 }
 0x732   :  { %1702 = vmatprep.subr.mxu1 %v1084_v1 }
 0x733   :  { %1703 = vmatpush3.msra.mxu1 %v1084_v1 }
 0x734   :  { %1742 = vmatprep.subr.mxu1 %v1319_v50 }
 0x7b5   :  { %v1046_v46 = vpop.xlane.xlu0 %1045 }
 0x7b6   :  { %v1049_v47 = vmul.f32 0.03125, %v1046_v46 }
 0x7b7   :  { %v1043_v49 = vpop.xlane.xlu1 %1042 }
 0x7b8   :  { %v1051_v51 = vsub.f32 %v1038_v40, %v1049_v47  ;;  %v1048_v55 = vmul.f32 0.03125, %v1043_v49 }
 0x7ba   :  { %v1050_v59 = vsub.f32 %v1037_v42, %v1048_v55  ;;  %v1053_v60 = vmul.f32 %v1051_v51, %v1051_v51 }
 0x7bc   :  { %v1057_v61 = vsel %vm295_vm8, %v1053_v60, 0.0  ;;  %v1052_v62 = vmul.f32 %v1050_v59, %v1050_v59 }
 0x7bd   :  { %1058 = vadd.xlane.f32.xlu1 %v1057_v61 }
 0x7be   :  { %v1054_v45 = vsel %vm295_vm8, %v1052_v62, 0.0 }
 0x7bf   :  { %1055 = vadd.xlane.f32.xlu0 %v1054_v45 }
 0x846   :  { %v1059_v3 = vpop.xlane.xlu1 %1058 }
 0x847   :  { %v1061_v4 = vmul.f32 0.03125, %v1059_v3  ;;  %v1318_v3 = vld [vmem:[%s2335_s17 + $0x10] sm:$0xff] }
 0x848   :  { %v1056_v5 = vpop.xlane.xlu0 %1055 }
 0x849   :  { %v1063_v6 = vadd.f32 1e-05, %v1061_v4  ;;  %v1060_v7 = vmul.f32 0.03125, %v1056_v5  ;;  %v1317_v4 = vld [vmem:[%s2335_s17 + $0x8] sm:$0xff]  ;;  %v1316_v5 = vld [vmem:[%s2335_s17] sm:$0xff] }
 0x84b   :  { %1798 = vrsqrt.f32 %v1063_v6  ;;  %v1062_v8 = vadd.f32 1e-05, %v1060_v7 }
 0x84d   :  { %1800 = vrsqrt.f32 %v1062_v8 }
 0x858   :  { %v1799_v9 = vpop.eup %1798 }
 0x859   :  { %v1067_v10 = vmul.f32 %v1799_v9, %v1051_v51 }
 0x85a   :  { %v1801_v11 = vpop.eup %1800 }
 0x85b   :  { %v1066_v54 = vmul.f32 %v1801_v11, %v1050_v59  ;;  %v1075_v12 = vmul.f32 %v2221_v53, %v1067_v10 }
 0x85d   :  { %v1074_v13 = vmul.f32 %v2221_v53, %v1066_v54  ;;  %v2234_v57 = vadd.f32 %v2227_v52, %v1075_v12 }
 0x85f   :  { %v2231_v14 = vadd.f32 %v2227_v52, %v1074_v13 }
 0x861   :  { %1704 = vmatprep.mubr.msk.f32.mxu1 %vm295_vm8, %v2231_v14 }
 0x862   :  { %1705 = vmatmul.mubr.msk.f32.vlgmr.msra.gmra.mxu1 %vm295_vm8, %v2234_v57 }
 0x863   :  { %1743 = vmatpush3.msra.mxu1 %v1319_v50 }
 0x864   :  { %1744 = vmatprep.subr.mxu1 %v1318_v3 }
 0x865   :  { %1745 = vmatpush3.msra.mxu1 %v1318_v3 }
 0x866   :  { %1746 = vmatprep.subr.mxu1 %v1317_v4 }
 0x867   :  { %1747 = vmatpush3.msra.mxu1 %v1317_v4 }
 0x868   :  { %1748 = vmatprep.subr.mxu1 %v1316_v5 }
 0x869   :  { %1749 = vmatpush3.msra.mxu1 %v1316_v5 }
 0x922   :  { %v1706_v28 = vpop.f32.mrf.mxu1 }
 0x923   :  { %v1173_v29 = vadd.f32 %v1706_v28, %v1457_v27 }
 0x924   :  { %v1167_v25 = vpop.f32.mrf.mxu1 }
 0x925   :  { %v1179_v30 = vmul.f32 0.70710677, %v1173_v29  ;;  %v1168_v31 = vadd.f32 %v1457_v27, %v1167_v25  ;;  %v1177_v38 = vmul.f32 0.5, %v1173_v29 }
 0x927   :  { %1802 = verf.f32 %v1179_v30  ;;  %v1178_v32 = vmul.f32 0.70710677, %v1168_v31  ;;  %v1176_v36 = vmul.f32 0.5, %v1168_v31 }
 0x929   :  { %1804 = verf.f32 %v1178_v32 }
 0x934   :  { %v1803_v33 = vpop.eup %1802 }
 0x935   :  { %v1183_v35 = vadd.f32 1.0, %v1803_v33 }
 0x936   :  { %v1805_v34 = vpop.eup %1804 }
 0x937   :  { %v1182_v37 = vadd.f32 1.0, %v1805_v34  ;;  %v1185_v40 = vmul.f32 %v1183_v35, %v1177_v38 }
 0x939   :  { %v1184_v39 = vmul.f32 %v1182_v37, %v1176_v36 }
 0x93b   :  { %1739 = vmatprep.mubr.f32.mxu0 %v1184_v39 }
 0x93c   :  { %1740 = vmatmul.mubr.f32.vlgmr.msra.gmra.mxu0 %v1185_v40 }
 0x9fc   :  { %v1741_v42 = vpop.f32.mrf.mxu0 }
 0x9fd   :  { %v1281_v43 = vadd.f32 %v1741_v42, %v1460_v41 }
 0x9fe   :  { %v1275_v46 = vpop.f32.mrf.mxu0 }
 0x9ff   :  { %v1276_v47 = vadd.f32 %v1460_v41, %v1275_v46  ;;  %v1285_v49 = vadd.f32 %v1281_v43, %v2234_v57 }
 0xa01   :  { %v1289_v51 = vsel %vm295_vm8, %v1285_v49, 0.0  ;;  %v1284_v55 = vadd.f32 %v1276_v47, %v2231_v14 }
 0xa02   :  { %1290 = vadd.xlane.f32.xlu1 %v1289_v51 }
 0xa03   :  { %v1286_v59 = vsel %vm295_vm8, %v1284_v55, 0.0 }
 0xa04   :  { %1287 = vadd.xlane.f32.xlu0 %v1286_v59 }
 0xa8b   :  { %v1291_v60 = vpop.xlane.xlu1 %1290 }
 0xa8c   :  { %v1293_v61 = vmul.f32 0.03125, %v1291_v60 }
 0xa8d   :  { %v1288_v62 = vpop.xlane.xlu0 %1287 }
 0xa8e   :  { %v1295_v45 = vsub.f32 %v1285_v49, %v1293_v61  ;;  %v1292_v44 = vmul.f32 0.03125, %v1288_v62 }
 0xa90   :  { %v1294_v63 = vsub.f32 %v1284_v55, %v1292_v44  ;;  %v1297_v0 = vmul.f32 %v1295_v45, %v1295_v45 }
 0xa92   :  { %v1301_v1 = vsel %vm295_vm8, %v1297_v0, 0.0  ;;  %v1296_v48 = vmul.f32 %v1294_v63, %v1294_v63 }
 0xa93   :  { %1302 = vadd.xlane.f32.xlu1 %v1301_v1 }
 0xa94   :  { %v1298_v2 = vsel %vm295_vm8, %v1296_v48, 0.0 }
 0xa95   :  { %1299 = vadd.xlane.f32.xlu0 %v1298_v2 }
 0xb1c   :  { %v1303_v6 = vpop.xlane.xlu1 %1302 }
 0xb1d   :  { %v1305_v7 = vmul.f32 0.03125, %v1303_v6 }
 0xb1e   :  { %v1300_v8 = vpop.xlane.xlu0 %1299 }
 0xb1f   :  { %v1307_v9 = vadd.f32 1e-05, %v1305_v7  ;;  %v1304_v10 = vmul.f32 0.03125, %v1300_v8 }
 0xb21   :  { %1806 = vrsqrt.f32 %v1307_v9  ;;  %v1306_v11 = vadd.f32 1e-05, %v1304_v10 }
 0xb23   :  { %1808 = vrsqrt.f32 %v1306_v11 }
 0xb2e   :  { %v1807_v54 = vpop.eup %1806 }
 0xb2f   :  { %v1311_v12 = vmul.f32 %v1807_v54, %v1295_v45 }
 0xb30   :  { %v1809_v13 = vpop.eup %1808 }
 0xb31   :  { %v1310_v14 = vmul.f32 %v1809_v13, %v1294_v63  ;;  %v1313_v57 = vmul.f32 %v2221_v53, %v1311_v12 }
 0xb33   :  { %v1312_v15 = vmul.f32 %v2221_v53, %v1310_v14  ;;  %v1315_v56 = vadd.f32 %v2227_v52, %v1313_v57 }
 0xb35   :  { %v1314_v16 = vadd.f32 %v2227_v52, %v1312_v15 }
 0xb37   :  { %1750 = vmatprep.mubr.msk.f32.mxu1 %vm295_vm8, %v1314_v16 }
 0xb38   :  { %1751 = vmatmul.mubr.msk.f32.vlgmr.msra.gmra.mxu1 %vm295_vm8, %v1315_v56 }
 0xbf8   :  { %v1752_v58 = vpop.f32.mrf.mxu1 }
 0xbf9   :  { %v1405_v18 = vadd.f32 %v1752_v58, %v1461_v17 }
 0xbfa   :  { %v1399_v19 = vpop.f32.mrf.mxu1 }
 0xbfb   :  { %1409 = vst [vmem:[%s2337_s19 + $0x8] sm:$0xff] %v1405_v18  ;;  %v1400_v53 = vadd.f32 %v1461_v17, %v1399_v19 }
 0xbfd   :  { %1408 = vst [vmem:[%s2337_s19] sm:$0xff] %v1400_v53 }

</bundles_post_ra>
